<compile_context>
chip_gen: v7x
topology: tpu7x:2x2x1
jax: 0.10.0
libtpu: 0.0.40
codegen_flags: <defaults>
</compile_context>

<pallas_src>
import functools

import jax
import jax.numpy as jnp
from jax.experimental import pallas as pl
from jax.experimental.pallas import tpu as pltpu


def _round_up(x, m):
    return (x + m - 1) // m * m


# ----------------------------- Pallas kernels -----------------------------

def _mm_kernel(x_ref, w_ref, b_ref, o_ref, acc_ref, *, relu, nk):
    k = pl.program_id(2)

    @pl.when(k == 0)
    def _():
        acc_ref[...] = jnp.zeros_like(acc_ref)

    acc_ref[...] += jnp.dot(x_ref[...], w_ref[...],
                            preferred_element_type=jnp.float32)

    @pl.when(k == nk - 1)
    def _():
        y = acc_ref[...] + b_ref[...]
        if relu:
            y = jnp.maximum(y, 0.0)
        o_ref[...] = y.astype(o_ref.dtype)


def _mm_res_kernel(x_ref, w_ref, b_ref, r_ref, o_ref, acc_ref, *, relu, nk):
    k = pl.program_id(2)

    @pl.when(k == 0)
    def _():
        acc_ref[...] = jnp.zeros_like(acc_ref)

    acc_ref[...] += jnp.dot(x_ref[...], w_ref[...],
                            preferred_element_type=jnp.float32)

    @pl.when(k == nk - 1)
    def _():
        y = acc_ref[...] + b_ref[...] + r_ref[...].astype(jnp.float32)
        if relu:
            y = jnp.maximum(y, 0.0)
        o_ref[...] = y.astype(o_ref.dtype)


def _band_conv3x3_kernel(x_ref, w_ref, b_ref, o_ref, acc_ref, *, offs, relu):
    # x_ref: (band_len, Cin) bf16 -- a row-flattened, padded band of the image.
    # Each tap is a statically shifted slice of the band; nine MXU matmuls
    # accumulate into the f32 scratch, then bias + ReLU + bf16 store.
    mp = o_ref.shape[0]
    acc_ref[...] = jnp.dot(x_ref[pl.ds(offs[0], mp), :], w_ref[0],
                           preferred_element_type=jnp.float32)
    for t in range(1, 9):
        acc_ref[...] += jnp.dot(x_ref[pl.ds(offs[t], mp), :], w_ref[t],
                                preferred_element_type=jnp.float32)
    y = acc_ref[...] + b_ref[...]
    if relu:
        y = jnp.maximum(y, 0.0)
    o_ref[...] = y.astype(o_ref.dtype)


def _max3_kernel(a_ref, b_ref, c_ref, o_ref):
    o_ref[...] = jnp.maximum(jnp.maximum(a_ref[...], b_ref[...]), c_ref[...])


def _avgpool_kernel(x_ref, o_ref):
    o_ref[...] = jnp.mean(x_ref[...].astype(jnp.float32), axis=1)


# ----------------------------- GEMM wrapper -----------------------------

_TM_MAX = 512   # M tile (rows of flattened pixels / im2col patches)


def _choose_tn(npad):
    for tn in (512, 256, 128):
        if npad % tn == 0:
            return tn
    return 128


def _choose_tk(k):
    if k % 128 != 0:
        return k               # single full-K block (block == full dim is legal)
    for tk in (512, 384, 256, 128):
        if k % tk == 0:
            return tk
    return k


def matmul_bias_act(x, cp, residual=None, relu=True):
    """y = act(x @ w_folded + bias [+ residual]); x:(M,K) bf16 -> (M, cout) bf16."""
    w, b = cp["w"], cp["b"]
    n_out = cp["cout"]
    m, k = x.shape
    kp, npad = w.shape
    assert kp == k, (kp, k)
    tk = cp["tk"]
    nk = k // tk

    mp = _round_up(m, 16)                 # bf16 sublane packing: >= 16 rows
    tm = mp if mp <= _TM_MAX else _TM_MAX
    mp = _round_up(m, tm)

    tn = cp["tn"]
    if mp // tm == 1 and npad // tn == 1 and tn > 128:
        tn //= 2                          # keep >= 2 parallel blocks (v7x megacore)

    x = x.astype(jnp.bfloat16)
    if mp != m:
        x = jnp.pad(x, ((0, mp - m), (0, 0)))

    in_specs = [
        pl.BlockSpec((tm, tk), lambda i, j, kk: (i, kk)),
        pl.BlockSpec((tk, tn), lambda i, j, kk: (kk, j)),
        pl.BlockSpec((1, tn), lambda i, j, kk: (0, j)),
    ]
    args = [x, w, b]
    if residual is not None:
        # Residual-path Cout is always 128-aligned -> no Cout padding needed.
        assert residual.shape == (m, npad), (residual.shape, m, npad)
        r = residual.astype(jnp.bfloat16)
        if mp != m:
            r = jnp.pad(r, ((0, mp - m), (0, 0)))
        in_specs.append(pl.BlockSpec((tm, tn), lambda i, j, kk: (i, j)))
        args.append(r)
        kernel = functools.partial(_mm_res_kernel, relu=relu, nk=nk)
    else:
        kernel = functools.partial(_mm_kernel, relu=relu, nk=nk)

    out = pl.pallas_call(
        kernel,
        out_shape=jax.ShapeDtypeStruct((mp, npad), jnp.bfloat16),
        grid=(mp // tm, npad // tn, nk),
        in_specs=in_specs,
        out_specs=pl.BlockSpec((tm, tn), lambda i, j, kk: (i, j)),
        scratch_shapes=[pltpu.VMEM((tm, tn), jnp.float32)],
        compiler_params=pltpu.CompilerParams(
            dimension_semantics=("parallel", "parallel", "arbitrary")),
    )(*args)
    return out[:m, :n_out]


# -------------------- implicit-GEMM 3x3 stride-1 conv --------------------

_BAND_M_MAX = 1024   # target rows per band GEMM tile


def _pick_band_rows(h, w):
    """Largest divisor th of h with th*(w+2) <= _BAND_M_MAX and 8-aligned (or th == h)."""
    for th in range(h, 0, -1):
        if h % th:
            continue
        mp = th * (w + 2)
        if mp > _BAND_M_MAX:
            continue
        if th == h or mp % 8 == 0:
            return th
    return h    # single full-height band (block == full dim is always layout-legal)


def conv3x3_band(x, cp, relu=True):
    """3x3 stride-1 pad-1 conv + folded BN + ReLU as an implicit ("band") GEMM.

    No im2col: the kernel reads a padded row-band of the NHWC activation and
    accumulates the nine taps from nine statically shifted slices of the
    row-flattened band.  The only extra HBM traffic is the ~1.1x banded copy
    of the input and a width-crop of the (width-padded) output.
    """
    n, h, w, c = x.shape
    cout = cp["cout"]
    wq, bias = cp["w"], cp["b"]
    npad = wq.shape[-1]

    th = _pick_band_rows(h, w)
    nb = h // th
    mp = th * (w + 2)
    band_rows = th + 3                       # th output rows + 2 halo + 1 slack row
    band_len = band_rows * (w + 2)

    tn = cp["tn"]
    if n * nb == 1 and npad // tn == 1 and tn > 128:
        tn //= 2                             # keep >= 2 parallel blocks (v7x megacore)

    xp = jnp.pad(x.astype(jnp.bfloat16), ((0, 0), (1, 2), (1, 1), (0, 0)))
    xb = jnp.stack([xp[:, i * th:i * th + band_rows] for i in range(nb)], axis=1)
    xb = xb.reshape(n, nb, band_len, c)

    offs = tuple(dy * (w + 2) + dx for dy in range(3) for dx in range(3))
    kernel = functools.partial(_band_conv3x3_kernel, offs=offs, relu=relu)

    out = pl.pallas_call(
        kernel,
        out_shape=jax.ShapeDtypeStruct((n, nb * mp, npad), jnp.bfloat16),
        grid=(npad // tn, n, nb),   # cout tiles outermost: the weight tile stays resident
        in_specs=[
            pl.BlockSpec((None, None, band_len, c), lambda j, b_, i: (b_, i, 0, 0)),
            pl.BlockSpec((9, c, tn), lambda j, b_, i: (0, 0, j)),
            pl.BlockSpec((1, tn), lambda j, b_, i: (0, j)),
        ],
        out_specs=pl.BlockSpec((None, mp, tn), lambda j, b_, i: (b_, i, j)),
        scratch_shapes=[pltpu.VMEM((mp, tn), jnp.float32)],
        compiler_params=pltpu.CompilerParams(
            dimension_semantics=("parallel", "parallel", "parallel")),
    )(xb, wq, bias)

    # Drop the two garbage width columns and the Cout padding.
    return out.reshape(n, h, w + 2, npad)[:, :, :w, :cout]


# ----------------------------- conv / pool wrappers -----------------------------

def _im2col(x, kh, kw, stride, pad):
    """NHWC bf16 -> patches (N*OH*OW, kh*kw*C), flattened in (kh, kw, c) order."""
    x = x.astype(jnp.bfloat16)
    if pad > 0:
        x = jnp.pad(x, ((0, 0), (pad, pad), (pad, pad), (0, 0)))
    n, h, w, c = x.shape
    oh = (h - kh) // stride + 1
    ow = (w - kw) // stride + 1
    cols = []
    for i in range(kh):
        for j in range(kw):
            cols.append(x[:, i:i + stride * oh:stride, j:j + stride * ow:stride, :])
    patches = jnp.concatenate(cols, axis=-1)
    return patches.reshape(n * oh * ow, kh * kw * c), (n, oh, ow)


def conv_bn(x, cp, stride=1, pad=0, relu=True, residual=None):
    """Conv2d (no bias) + folded BatchNorm (+residual) + optional ReLU. x: NHWC bf16."""
    kh, kw = cp["kh"], cp["kw"]
    if kh == 1 and kw == 1 and pad == 0:
        if stride > 1:
            # TODO(synk): fold the stride-2 row selection into the GEMM index_map
            # instead of this XLA strided-slice copy.
            x = x[:, ::stride, ::stride, :]
        n, oh, ow, _ = x.shape
        patches = x.reshape(n * oh * ow, x.shape[-1])
    else:
        patches, (n, oh, ow) = _im2col(x, kh, kw, stride, pad)
    res2 = None if residual is None else residual.reshape(n * oh * ow, cp["cout"])
    y = matmul_bias_act(patches, cp, residual=res2, relu=relu)
    return y.reshape(n, oh, ow, cp["cout"])


_POOL_ROWS = 512
_POOL_COLS = 512


def _elemwise_max3(a, b, c):
    """Elementwise max of three equal-shape arrays via a tiled Pallas kernel."""
    shape, dtype = a.shape, a.dtype
    flat = a.size
    ep = _round_up(flat, _POOL_ROWS * _POOL_COLS)

    def prep(t):
        t = t.reshape(-1)
        if ep != flat:
            t = jnp.pad(t, (0, ep - flat))
        return t.reshape(ep // _POOL_COLS, _POOL_COLS)

    rows = ep // _POOL_COLS
    out = pl.pallas_call(
        _max3_kernel,
        out_shape=jax.ShapeDtypeStruct((rows, _POOL_COLS), dtype),
        grid=(rows // _POOL_ROWS,),
        in_specs=[pl.BlockSpec((_POOL_ROWS, _POOL_COLS), lambda i: (i, 0))] * 3,
        out_specs=pl.BlockSpec((_POOL_ROWS, _POOL_COLS), lambda i: (i, 0)),
        compiler_params=pltpu.CompilerParams(
            dimension_semantics=("parallel",)),
    )(prep(a), prep(b), prep(c))
    return out.reshape(-1)[:flat].reshape(shape)


def maxpool_3x3_s2_p1(x):
    """MaxPool2d(kernel=3, stride=2, padding=1) on bf16 NHWC, two separable passes."""
    n, h, w, c = x.shape
    xpad = jnp.pad(x, ((0, 0), (1, 1), (1, 1), (0, 0)),
                   constant_values=-jnp.inf)
    oh = (h - 1) // 2 + 1
    ow = (w - 1) // 2 + 1
    # pass 1: 3-tap max along W (stride 2)
    t = _elemwise_max3(*[xpad[:, :, j:j + 2 * ow:2, :] for j in range(3)])
    # pass 2: 3-tap max along H (stride 2)
    return _elemwise_max3(*[t[:, i:i + 2 * oh:2, :, :] for i in range(3)])


def global_avgpool(x):
    """AdaptiveAvgPool2d((1,1)) + flatten: bf16 NHWC -> (N, C) f32, tiled over channels."""
    n, h, w, c = x.shape
    xr = x.reshape(n, h * w, c)
    tc = 256 if c % 256 == 0 else c
    return pl.pallas_call(
        _avgpool_kernel,
        out_shape=jax.ShapeDtypeStruct((n, c), jnp.float32),
        grid=(c // tc,),
        in_specs=[pl.BlockSpec((n, h * w, tc), lambda i: (0, 0, i))],
        out_specs=pl.BlockSpec((n, tc), lambda i: (0, i)),
        compiler_params=pltpu.CompilerParams(
            dimension_semantics=("parallel",)),
    )(xr)


# ----------------------------- parameter setup -----------------------------

def make_conv(key, kh, kw, cin, cout):
    fan_in = kh * kw * cin
    std = (2.0 / fan_in) ** 0.5
    return std * jax.random.normal(key, (kh, kw, cin, cout), jnp.float32)


def make_bn(key, c, eps=1e-5):
    k1, k2, k3, k4 = jax.random.split(key, 4)
    gamma = 1.0 + 0.1 * jax.random.normal(k1, (c,), jnp.float32)
    beta = 0.1 * jax.random.normal(k2, (c,), jnp.float32)
    mean = 0.1 * jax.random.normal(k3, (c,), jnp.float32)
    var = 1.0 + 0.1 * jax.random.uniform(k4, (c,), jnp.float32)
    scale = gamma / jnp.sqrt(var + eps)       # folded inference-mode BN
    bias = beta - mean * scale
    return scale, bias


def _choose_tn_band(cin, npad):
    tn = _choose_tn(npad)
    if cin >= 512:
        tn = min(tn, 256)      # cap the resident (9, Cin, tn) weight tile in VMEM
    return tn


def prep_conv_bn(w, scale, bias, band=False):
    """Fold BN scale into weights, reshape to kernel layout, pad Cout, cast bf16 (once)."""
    kh, kw, cin, cout = w.shape
    npad = _round_up(cout, 128)
    wf = (w * scale).astype(jnp.bfloat16)
    bq = jnp.zeros((1, npad), jnp.float32).at[0, :cout].set(bias)
    if band:
        assert (kh, kw) == (3, 3)
        wq = jnp.zeros((9, cin, npad), jnp.bfloat16).at[:, :, :cout].set(
            wf.reshape(9, cin, cout))
        return {"w": wq, "b": bq, "cout": cout, "kh": kh, "kw": kw,
                "tn": _choose_tn_band(cin, npad), "band": True}
    k = kh * kw * cin
    wq = jnp.zeros((k, npad), jnp.bfloat16).at[:, :cout].set(wf.reshape(k, cout))
    return {"w": wq, "b": bq, "cout": cout, "kh": kh, "kw": kw,
            "tn": _choose_tn(npad), "tk": _choose_tk(k), "band": False}


def make_bottleneck(key, cin, planes, stride):
    keys = jax.random.split(key, 8)
    cout = planes * 4
    p = {
        "conv1": prep_conv_bn(make_conv(keys[0], 1, 1, cin, planes),
                              *make_bn(keys[1], planes)),
        "conv2": prep_conv_bn(make_conv(keys[2], 3, 3, planes, planes),
                              *make_bn(keys[3], planes), band=(stride == 1)),
        "conv3": prep_conv_bn(make_conv(keys[4], 1, 1, planes, cout),
                              *make_bn(keys[5], cout)),
        "stride": stride,
    }
    if stride != 1 or cin != cout:
        p["down"] = prep_conv_bn(make_conv(keys[6], 1, 1, cin, cout),
                                 *make_bn(keys[7], cout))
    return p


def init_params(key):
    keys = jax.random.split(key, 18)
    params = {
        "stem": prep_conv_bn(make_conv(keys[0], 7, 7, 3, 64),
                             *make_bn(keys[1], 64)),
        "layers": [],
    }
    cfg = [(64, 3, 1), (128, 4, 2), (256, 6, 2), (512, 3, 2)]  # resnet50
    cin, ki = 64, 2
    for planes, blocks, stride in cfg:
        layer = []
        for b in range(blocks):
            s = stride if b == 0 else 1
            layer.append(make_bottleneck(keys[ki], cin, planes, s))
            ki += 1
            cin = planes * 4
        params["layers"].append(layer)
    return params


# ----------------------------- forward pass -----------------------------

def bottleneck_forward(x, p):
    stride = p["stride"]
    if "down" in p:
        identity = conv_bn(x, p["down"], stride=stride, pad=0, relu=False)
    else:
        identity = x
    y = conv_bn(x, p["conv1"], stride=1, pad=0, relu=True)
    if p["conv2"]["band"]:
        y = conv3x3_band(y, p["conv2"], relu=True)          # implicit GEMM, no im2col
    else:
        y = conv_bn(y, p["conv2"], stride=stride, pad=1, relu=True)
    # out = relu(bn3(conv3(y)) + identity) -- residual add + ReLU fused in the epilogue
    y = conv_bn(y, p["conv3"], stride=1, pad=0, relu=True, residual=identity)
    return y


def image_encoder_forward(params, images_nchw):
    """ImageEncoder.forward: ResNet50 trunk (no fc) + flatten -> (N, 2048) f32."""
    x = jnp.transpose(images_nchw, (0, 2, 3, 1)).astype(jnp.bfloat16)  # NCHW -> NHWC bf16
    x = conv_bn(x, params["stem"], stride=2, pad=3, relu=True)
    x = maxpool_3x3_s2_p1(x)
    for layer in params["layers"]:
        for blk in layer:
            x = bottleneck_forward(x, blk)
    return global_avgpool(x)      # AdaptiveAvgPool2d((1,1)) + view(N, -1)


if __name__ == "__main__":
    key = jax.random.PRNGKey(0)
    pkey, xkey = jax.random.split(key)
    params = init_params(pkey)
    images = jax.random.normal(xkey, (2, 3, 32, 32), jnp.float32)  # small NCHW input

    feats = image_encoder_forward(params, images)
    feats = jax.block_until_ready(feats)

    assert feats.shape == (2, 2048), feats.shape
    assert bool(jnp.all(jnp.isfinite(feats)))
    print("KERNEL_OK")
</pallas_src>

<mosaic_0001>
module attributes {stable_mosaic.version = 11 : i64} {
  func.func @_mm_kernel(%arg0: i32, %arg1: i32, %arg2: i32, %arg3: memref<512x147xbf16, #tpu.memory_space<vmem>>, %arg4: memref<147x128xbf16, #tpu.memory_space<vmem>>, %arg5: memref<1x128xf32, #tpu.memory_space<vmem>>, %arg6: memref<512x128xbf16, #tpu.memory_space<vmem>>, %arg7: memref<512x128xf32, #tpu.memory_space<vmem>>) attributes {dimension_semantics = [#tpu.dimension_semantics<parallel>, #tpu.dimension_semantics<parallel>, #tpu.dimension_semantics<arbitrary>], iteration_bounds = array<i64: 1, 1, 1>, scalar_prefetch = 0 : i64, scratch_operands = 1 : i64, tpu.core_type = #tpu.core_type<tc>, window_params = [{transform_indices = @transform_0, window_bounds = array<i64: 512, 147>}, {transform_indices = @transform_1, window_bounds = array<i64: 147, 128>}, {transform_indices = @transform_2, window_bounds = array<i64: 1, 128>}, {transform_indices = @transform_3, window_bounds = array<i64: 512, 128>}]} {
    %c0_i32 = arith.constant 0 : i32
    %0 = arith.cmpi eq, %arg2, %c0_i32 : i32
    %1 = arith.extui %0 : i1 to i32
    %c0_i32_0 = arith.constant 0 : i32
    %2 = arith.cmpi ne, %1, %c0_i32_0 : i32
    scf.if %2 {
      %cst_10 = arith.constant 0.000000e+00 : f32
      %12 = vector.broadcast %cst_10 : f32 to vector<512x128xf32>
      %c0_11 = arith.constant 0 : index
      %c0_12 = arith.constant 0 : index
      %13 = vector.load %arg7[%c0_11, %c0_12] : memref<512x128xf32, #tpu.memory_space<vmem>>, vector<512x128xf32>
      tpu.vector_store %arg7[%c0_11, %c0_12], %12 {strides = array<i32>} : memref<512x128xf32, #tpu.memory_space<vmem>>, vector<512x128xf32>,
    } else {
    }
    %c0 = arith.constant 0 : index
    %c0_1 = arith.constant 0 : index
    %3 = vector.load %arg7[%c0, %c0_1] : memref<512x128xf32, #tpu.memory_space<vmem>>, vector<512x128xf32>
    %c0_2 = arith.constant 0 : index
    %c0_3 = arith.constant 0 : index
    %4 = vector.load %arg3[%c0_2, %c0_3] : memref<512x147xbf16, #tpu.memory_space<vmem>>, vector<512x147xbf16>
    %c0_4 = arith.constant 0 : index
    %c0_5 = arith.constant 0 : index
    %5 = vector.load %arg4[%c0_4, %c0_5] : memref<147x128xbf16, #tpu.memory_space<vmem>>, vector<147x128xbf16>
    %cst = arith.constant dense<0.000000e+00> : vector<512x128xf32>
    %6 = tpu.matmul %4, %5, %cst {dimension_numbers = #tpu.dot_dimension_numbers<[1], [0], [0], [1], [0, 0, 1, 1], [], []>} : vector<512x147xbf16>, vector<147x128xbf16>, vector<512x128xf32> -> vector<512x128xf32>
    %7 = arith.addf %3, %6 : vector<512x128xf32>
    %c0_6 = arith.constant 0 : index
    %c0_7 = arith.constant 0 : index
    %8 = vector.load %arg7[%c0_6, %c0_7] : memref<512x128xf32, #tpu.memory_space<vmem>>, vector<512x128xf32>
    tpu.vector_store %arg7[%c0_6, %c0_7], %7 {strides = array<i32>} : memref<512x128xf32, #tpu.memory_space<vmem>>, vector<512x128xf32>,
    %c0_i32_8 = arith.constant 0 : i32
    %9 = arith.cmpi eq, %arg2, %c0_i32_8 : i32
    %10 = arith.extui %9 : i1 to i32
    %c0_i32_9 = arith.constant 0 : i32
    %11 = arith.cmpi ne, %10, %c0_i32_9 : i32
    scf.if %11 {
      %c0_10 = arith.constant 0 : index
      %c0_11 = arith.constant 0 : index
      %12 = vector.load %arg7[%c0_10, %c0_11] : memref<512x128xf32, #tpu.memory_space<vmem>>, vector<512x128xf32>
      %c0_12 = arith.constant 0 : index
      %c0_13 = arith.constant 0 : index
      %13 = vector.load %arg5[%c0_12, %c0_13] : memref<1x128xf32, #tpu.memory_space<vmem>>, vector<1x128xf32>
      %14 = vector.broadcast %13 : vector<1x128xf32> to vector<512x128xf32>
      %15 = arith.addf %12, %14 : vector<512x128xf32>
      %cst_14 = arith.constant 0.000000e+00 : f32
      %16 = vector.broadcast %cst_14 : f32 to vector<512x128xf32>
      %17 = arith.maximumf %15, %16 : vector<512x128xf32>
      %18 = arith.truncf %17 : vector<512x128xf32> to vector<512x128xbf16>
      %c0_15 = arith.constant 0 : index
      %c0_16 = arith.constant 0 : index
      %19 = vector.load %arg6[%c0_15, %c0_16] : memref<512x128xbf16, #tpu.memory_space<vmem>>, vector<512x128xbf16>
      tpu.vector_store %arg6[%c0_15, %c0_16], %18 {strides = array<i32>} : memref<512x128xbf16, #tpu.memory_space<vmem>>, vector<512x128xbf16>,
    } else {
    }
    return
  }
  func.func @transform_0(%arg0: i32, %arg1: i32, %arg2: i32) -> (i32, i32) {
    %c0_i32 = arith.constant 0 : i32
    return %arg0, %arg2 : i32, i32
  }
  func.func @transform_1(%arg0: i32, %arg1: i32, %arg2: i32) -> (i32, i32) {
    %c0_i32 = arith.constant 0 : i32
    return %arg2, %arg1 : i32, i32
  }
  func.func @transform_2(%arg0: i32, %arg1: i32, %arg2: i32) -> (i32, i32) {
    %c0_i32 = arith.constant 0 : i32
    %c0_i32_0 = arith.constant 0 : i32
    return %c0_i32, %arg1 : i32, i32
  }
  func.func @transform_3(%arg0: i32, %arg1: i32, %arg2: i32) -> (i32, i32) {
    %c0_i32 = arith.constant 0 : i32
    return %arg0, %arg1 : i32, i32
  }
}

</mosaic_0001>

<bundles_post_ra>
// kernel: tpu_custom_call.1
= control target key start
LH: loop header
LB: loop body
LE: loop exit
PB: predicated region body
PF: predicated region fallthrough
CT: control target
= control target key end

     0   :  { %v2216_v1 = vmov 0   ;;  %vm576_vm0 = vcmask 154624   ;;  %vm673_vm1 = vcmask 1040384   ;;  %vm674_vm2 = vcmask 1041408   ;;  %s2576_s0 = inlined_call_operand.vmem [shape: bf16[512,147], index: 0, kind: input, shape index: {}]   ;;  %s2577_s1 = inlined_call_operand.vmem [shape: bf16[147,128], index: 1, kind: input, shape index: {}]   ;;  %s2578_s2 = inlined_call_operand.vmem [shape: f32[1,128], index: 2, kind: input, shape index: {}]   ;;  %s2579_s3 = inlined_call_operand.hbm [shape: bf16[512,128], index: 3, kind: output, shape index: {}]  }
   0x1   :  { %v2086_v0 = vld [vmem:[%s2577_s1] sm:$0xff]   ;;  %680 = vmatprep.subr.bf16.mxu0 %v2216_v1  ;;  %2061 = vmatprep.subr.bf16.mxu1 %v2216_v1  ;;  %v2087_v2 = vld [vmem:[%s2577_s1 + $0x8] sm:$0xff]   ;;  %v2088_v3 = vld [vmem:[%s2577_s1 + $0x10] sm:$0xff]   ;;  %v2217_v11 = vmov 65535  }
   0x2   :  { %681 = vmatpush1.bf16.msra.mxu0 %v2086_v0  ;;  %2071 = vmatpush1.bf16.msra.mxu1 %v2086_v0  ;;  %v2089_v4 = vld [vmem:[%s2577_s1 + $0x18] sm:$0xff]   ;;  %v2098_v5 = vld [vmem:[%s2576_s0 + $0x4] ss:$8 sps:$4 sm:$0xff]   ;;  %v2092_v9 = vld [vmem:[%s2577_s1 + $0x30] sm:$0xff]   ;;  %v675_v12 = vsel %vm673_vm1, 4294967295, %v2217_v11 }
   0x3   :  { %682 = vmatprep.subr.bf16.mxu0 %v2216_v1  ;;  %2062 = vmatprep.subr.bf16.mxu1 %v2216_v1  ;;  %v2101_v6 = vld [vmem:[%s2576_s0 + $0x104] ss:$8 sps:$4 sm:$0xff]   ;;  %v2093_v10 = vld [vmem:[%s2577_s1 + $0x38] sm:$0xff]   ;;  %v2095_v14 = vld [vmem:[%s2577_s1 + $0x48] ss:$0 sps:$4 sm:$0x33]  }
   0x4   :  { %1709 = vmatprep.mubr.msk.bf16.mxu0 %vm576_vm0, %v2098_v5  ;;  %v2090_v7 = vld [vmem:[%s2577_s1 + $0x20] sm:$0xff]   ;;  %1725 = vmatprep.mubr.msk.bf16.mxu1 %vm576_vm0, %v2101_v6  ;;  %v2091_v8 = vld [vmem:[%s2577_s1 + $0x28] sm:$0xff]   ;;  %v676_v15 = vsel %vm674_vm2, %v675_v12, 0  ;;  %v2102_v19 = vld [vmem:[%s2576_s0 + $0x14] ss:$8 sps:$4 sm:$0xff]  }
   0x5   :  { %v2094_v13 = vld [vmem:[%s2577_s1 + $0x40] sm:$0xff]   ;;  %v678_v16 = vand.u32 %v2095_v14, %v676_v15  ;;  %v2104_v20 = vld [vmem:[%s2576_s0 + $0x114] ss:$8 sps:$4 sm:$0xff]   ;;  %v2106_v21 = vld [vmem:[%s2576_s0 + $0x10] ss:$8 sps:$4 sm:$0xff]  }
   0x6   :  { %683 = vmatpush1.bf16.msra.mxu0 %v2087_v2  ;;  %2072 = vmatpush1.bf16.msra.mxu1 %v2087_v2  ;;  %v2096_v17 = vld [vmem:[%s2576_s0] ss:$8 sps:$4 sm:$0xff]   ;;  %v2107_v22 = vld [vmem:[%s2576_s0 + $0x110] ss:$8 sps:$4 sm:$0xff]   ;;  %v2108_v23 = vld [vmem:[%s2576_s0 + $0x24] ss:$8 sps:$4 sm:$0xff]  }
   0x7   :  { %684 = vmatprep.subr.bf16.mxu0 %v2216_v1  ;;  %2063 = vmatprep.subr.bf16.mxu1 %v2216_v1  ;;  %v2099_v18 = vld [vmem:[%s2576_s0 + $0x100] ss:$8 sps:$4 sm:$0xff]   ;;  %v2110_v24 = vld [vmem:[%s2576_s0 + $0x124] ss:$8 sps:$4 sm:$0xff]  }
   0xa   :  { %685 = vmatpush1.bf16.msra.mxu0 %v2088_v3  ;;  %2073 = vmatpush1.bf16.msra.mxu1 %v2088_v3 }
   0xb   :  { %686 = vmatprep.subr.bf16.mxu0 %v2216_v1  ;;  %2064 = vmatprep.subr.bf16.mxu1 %v2216_v1 }
   0xe   :  { %687 = vmatpush1.bf16.msra.mxu0 %v2089_v4  ;;  %2074 = vmatpush1.bf16.msra.mxu1 %v2089_v4 }
   0xf   :  { %688 = vmatprep.subr.bf16.mxu0 %v2216_v1  ;;  %2065 = vmatprep.subr.bf16.mxu1 %v2216_v1 }
  0x12   :  { %689 = vmatpush1.bf16.msra.mxu0 %v2090_v7  ;;  %2075 = vmatpush1.bf16.msra.mxu1 %v2090_v7 }
  0x13   :  { %690 = vmatprep.subr.bf16.mxu0 %v2216_v1  ;;  %2066 = vmatprep.subr.bf16.mxu1 %v2216_v1 }
  0x16   :  { %691 = vmatpush1.bf16.msra.mxu0 %v2091_v8  ;;  %2076 = vmatpush1.bf16.msra.mxu1 %v2091_v8 }
  0x17   :  { %692 = vmatprep.subr.bf16.mxu0 %v2216_v1  ;;  %2067 = vmatprep.subr.bf16.mxu1 %v2216_v1 }
  0x1a   :  { %693 = vmatpush1.bf16.msra.mxu0 %v2092_v9  ;;  %2077 = vmatpush1.bf16.msra.mxu1 %v2092_v9 }
  0x1b   :  { %694 = vmatprep.subr.bf16.mxu0 %v2216_v1  ;;  %2068 = vmatprep.subr.bf16.mxu1 %v2216_v1 }
  0x1e   :  { %695 = vmatpush1.bf16.msra.mxu0 %v2093_v10  ;;  %2078 = vmatpush1.bf16.msra.mxu1 %v2093_v10 }
  0x1f   :  { %696 = vmatprep.subr.bf16.mxu0 %v2216_v1  ;;  %2069 = vmatprep.subr.bf16.mxu1 %v2216_v1 }
  0x22   :  { %697 = vmatpush1.bf16.msra.mxu0 %v2094_v13  ;;  %2079 = vmatpush1.bf16.msra.mxu1 %v2094_v13 }
  0x23   :  { %698 = vmatprep.subr.bf16.mxu0 %v2216_v1  ;;  %2070 = vmatprep.subr.bf16.mxu1 %v2216_v1 }
  0x26   :  { %699 = vmatpush1.bf16.msra.mxu0 %v678_v16  ;;  %2080 = vmatpush1.bf16.msra.mxu1 %v678_v16 }
  0x29   :  { %713 = vmatmul.mubr.bf16.vlgmr.msra.gmra.mrb[0].mxu0 %v2096_v17  ;;  %841 = vmatmul.mubr.bf16.vlgmr.msra.gmra.mrb[0].mxu1 %v2099_v18 }
  0x2a   :  { %1710 = vmatprep.mubr.msk.bf16.mxu0 %vm576_vm0, %v2102_v19  ;;  %1726 = vmatprep.mubr.msk.bf16.mxu1 %vm576_vm0, %v2104_v20 }
  0x31   :  { %721 = vmatmul.mubr.bf16.gmra.mrb[4].mxu0 %v2106_v21  ;;  %849 = vmatmul.mubr.bf16.gmra.mrb[4].mxu1 %v2107_v22 }
  0x32   :  { %1711 = vmatprep.mubr.msk.bf16.mxu0 %vm576_vm0, %v2108_v23  ;;  %1727 = vmatprep.mubr.msk.bf16.mxu1 %vm576_vm0, %v2110_v24 }
  0x33   :  { %8 = vsyncpa [#allocation4], 0  ;;  %v2112_v25 = vld [vmem:[%s2576_s0 + $0x20] ss:$8 sps:$4 sm:$0xff]   ;;  %v2114_v27 = vld [vmem:[%s2576_s0 + $0x34] ss:$8 sps:$4 sm:$0xff]  }
  0x34   :  { %v2113_v26 = vld [vmem:[%s2576_s0 + $0x120] ss:$8 sps:$4 sm:$0xff]   ;;  %v2116_v28 = vld [vmem:[%s2576_s0 + $0x134] ss:$8 sps:$4 sm:$0xff]   ;;  %v2118_v29 = vld [vmem:[%s2576_s0 + $0x30] ss:$8 sps:$4 sm:$0xff]  }
  0x35   :  { %v2119_v30 = vld [vmem:[%s2576_s0 + $0x130] ss:$8 sps:$4 sm:$0xff]   ;;  %v2120_v31 = vld [vmem:[%s2576_s0 + $0x44] ss:$8 sps:$4 sm:$0xff]   ;;  %v2124_v33 = vld [vmem:[%s2576_s0 + $0x40] ss:$8 sps:$4 sm:$0xff]  }
  0x36   :  { %v2122_v32 = vld [vmem:[%s2576_s0 + $0x144] ss:$8 sps:$4 sm:$0xff]   ;;  %v2125_v34 = vld [vmem:[%s2576_s0 + $0x140] ss:$8 sps:$4 sm:$0xff]   ;;  %v2126_v35 = vld [vmem:[%s2576_s0 + $0x54] ss:$8 sps:$4 sm:$0xff]  }
  0x37   :  { %v2128_v36 = vld [vmem:[%s2576_s0 + $0x154] ss:$8 sps:$4 sm:$0xff]   ;;  %v2130_v37 = vld [vmem:[%s2576_s0 + $0x50] ss:$8 sps:$4 sm:$0xff]   ;;  %v2132_v39 = vld [vmem:[%s2576_s0 + $0x64] ss:$8 sps:$4 sm:$0xff]  }
  0x38   :  { %v2131_v38 = vld [vmem:[%s2576_s0 + $0x150] ss:$8 sps:$4 sm:$0xff]   ;;  %v2134_v40 = vld [vmem:[%s2576_s0 + $0x164] ss:$8 sps:$4 sm:$0xff]   ;;  %v2136_v41 = vld [vmem:[%s2576_s0 + $0x60] ss:$8 sps:$4 sm:$0xff]  }
  0x39   :  { %729 = vmatmul.mubr.bf16.gmra.mrb[8].mxu0 %v2112_v25  ;;  %857 = vmatmul.mubr.bf16.gmra.mrb[8].mxu1 %v2113_v26  ;;  %v2137_v42 = vld [vmem:[%s2576_s0 + $0x160] ss:$8 sps:$4 sm:$0xff]   ;;  %v2138_v43 = vld [vmem:[%s2576_s0 + $0x74] ss:$8 sps:$4 sm:$0xff]   ;;  %v2142_v45 = vld [vmem:[%s2576_s0 + $0x70] ss:$8 sps:$4 sm:$0xff]  }
  0x3a   :  { %1712 = vmatprep.mubr.msk.bf16.mxu0 %vm576_vm0, %v2114_v27  ;;  %1728 = vmatprep.mubr.msk.bf16.mxu1 %vm576_vm0, %v2116_v28  ;;  %v2140_v44 = vld [vmem:[%s2576_s0 + $0x174] ss:$8 sps:$4 sm:$0xff]   ;;  %v2143_v46 = vld [vmem:[%s2576_s0 + $0x170] ss:$8 sps:$4 sm:$0xff]   ;;  %v2144_v47 = vld [vmem:[%s2576_s0 + $0x84] ss:$8 sps:$4 sm:$0xff]  }
  0x3b   :  { %v2146_v48 = vld [vmem:[%s2576_s0 + $0x184] ss:$8 sps:$4 sm:$0xff]   ;;  %v2148_v49 = vld [vmem:[%s2576_s0 + $0x80] ss:$8 sps:$4 sm:$0xff]   ;;  %v2150_v51 = vld [vmem:[%s2576_s0 + $0x94] ss:$8 sps:$4 sm:$0xff]  }
  0x3c   :  { %v2149_v50 = vld [vmem:[%s2576_s0 + $0x180] ss:$8 sps:$4 sm:$0xff]   ;;  %v2152_v52 = vld [vmem:[%s2576_s0 + $0x194] ss:$8 sps:$4 sm:$0xff]   ;;  %v2154_v53 = vld [vmem:[%s2576_s0 + $0x90] ss:$8 sps:$4 sm:$0xff]  }
  0x3d   :  { %v2155_v54 = vld [vmem:[%s2576_s0 + $0x190] ss:$8 sps:$4 sm:$0xff]   ;;  %v2156_v55 = vld [vmem:[%s2576_s0 + $0xa4] ss:$8 sps:$4 sm:$0xff]   ;;  %v2160_v57 = vld [vmem:[%s2576_s0 + $0xa0] ss:$8 sps:$4 sm:$0xff]  }
  0x3e   :  { %v2158_v56 = vld [vmem:[%s2576_s0 + $0x1a4] ss:$8 sps:$4 sm:$0xff]   ;;  %v2161_v58 = vld [vmem:[%s2576_s0 + $0x1a0] ss:$8 sps:$4 sm:$0xff]   ;;  %v2162_v59 = vld [vmem:[%s2576_s0 + $0xb4] ss:$8 sps:$4 sm:$0xff]  }
  0x3f   :  { %v2164_v60 = vld [vmem:[%s2576_s0 + $0x1b4] ss:$8 sps:$4 sm:$0xff]   ;;  %v2166_v61 = vld [vmem:[%s2576_s0 + $0xb0] ss:$8 sps:$4 sm:$0xff]   ;;  %v2168_v63 = vld [vmem:[%s2576_s0 + $0xc4] ss:$8 sps:$4 sm:$0xff]  }
  0x40   :  { %v2167_v62 = vld [vmem:[%s2576_s0 + $0x1b0] ss:$8 sps:$4 sm:$0xff]   ;;  %v2170_v0 = vld [vmem:[%s2576_s0 + $0x1c4] ss:$8 sps:$4 sm:$0xff]   ;;  %v2172_v1 = vld [vmem:[%s2576_s0 + $0xc0] ss:$8 sps:$4 sm:$0xff]  }
  0x41   :  { %737 = vmatmul.mubr.bf16.gmra.mrb[12].mxu0 %v2118_v29  ;;  %865 = vmatmul.mubr.bf16.gmra.mrb[12].mxu1 %v2119_v30  ;;  %v2173_v2 = vld [vmem:[%s2576_s0 + $0x1c0] ss:$8 sps:$4 sm:$0xff]   ;;  %v2174_v3 = vld [vmem:[%s2576_s0 + $0xd4] ss:$8 sps:$4 sm:$0xff]   ;;  %v2178_v5 = vld [vmem:[%s2576_s0 + $0xd0] ss:$8 sps:$4 sm:$0xff]  }
  0x42   :  { %1713 = vmatprep.mubr.msk.bf16.mxu0 %vm576_vm0, %v2120_v31  ;;  %1729 = vmatprep.mubr.msk.bf16.mxu1 %vm576_vm0, %v2122_v32  ;;  %v2176_v4 = vld [vmem:[%s2576_s0 + $0x1d4] ss:$8 sps:$4 sm:$0xff]   ;;  %v2179_v6 = vld [vmem:[%s2576_s0 + $0x1d0] ss:$8 sps:$4 sm:$0xff]   ;;  %v2180_v7 = vld [vmem:[%s2576_s0 + $0xe4] ss:$8 sps:$4 sm:$0xff]  }
  0x43   :  { %v2182_v8 = vld [vmem:[%s2576_s0 + $0x1e4] ss:$8 sps:$4 sm:$0xff]   ;;  %v2184_v9 = vld [vmem:[%s2576_s0 + $0xe0] ss:$8 sps:$4 sm:$0xff]   ;;  %v2186_v11 = vld [vmem:[%s2576_s0 + $0xf4] ss:$8 sps:$4 sm:$0xff]  }
  0x44   :  { %v2185_v10 = vld [vmem:[%s2576_s0 + $0x1e0] ss:$8 sps:$4 sm:$0xff]   ;;  %v2188_v12 = vld [vmem:[%s2576_s0 + $0x1f4] ss:$8 sps:$4 sm:$0xff]   ;;  %v2190_v13 = vld [vmem:[%s2576_s0 + $0xf0] ss:$8 sps:$4 sm:$0xff]  }
  0x45   :  { %v2191_v14 = vld [vmem:[%s2576_s0 + $0x1f0] ss:$8 sps:$4 sm:$0xff]   ;;  %v2498_v15 = vld [vmem:[%s2578_s2] ss:$0 sm:$0xff]  ;;  %s2218_s0 = smov [#allocation3]  }
  0x46   :  { %s1624_s2 = sshll.u32 %s2218_s0, 4  ;;  %s1625_s2 = int_to_ptr.vmem [resolvable:$true] %s1624_s2 }
  0x47   :  { %s2192_s22 = scalar_lea.vmem %s1625_s2, 4096  ;;  %p2197_p1 = scmp.lt.s32.totalorder %s1625_s2, %s1625_s2 }
  0x48   :  { %p2193_p0 = scmp.ne.s32.totalorder %s1625_s2, %s2192_s22  ;;  %p2198_p2 = scmp.lt.s32.totalorder %s2192_s22, %s2192_s22 }
  0x49   :  { %745 = vmatmul.mubr.bf16.gmra.mrb[16].mxu0 %v2124_v33  ;;  %873 = vmatmul.mubr.bf16.gmra.mrb[16].mxu1 %v2125_v34 }
  0x4a   :  { %1714 = vmatprep.mubr.msk.bf16.mxu0 %vm576_vm0, %v2126_v35  ;;  %1730 = vmatprep.mubr.msk.bf16.mxu1 %vm576_vm0, %v2128_v36  ;;  %p2199_p3 = por %p2198_p2, %p2197_p1 }
  0x4c   :  { %p2200_p4 = pnand %p2199_p3, %p2193_p0 }
  0x51   :  { %753 = vmatmul.mubr.bf16.gmra.mrb[20].mxu0 %v2130_v37  ;;  %881 = vmatmul.mubr.bf16.gmra.mrb[20].mxu1 %v2131_v38 }
  0x52   :  { %1715 = vmatprep.mubr.msk.bf16.mxu0 %vm576_vm0, %v2132_v39  ;;  %1731 = vmatprep.mubr.msk.bf16.mxu1 %vm576_vm0, %v2134_v40 }
  0x59   :  { %761 = vmatmul.mubr.bf16.gmra.mrb[24].mxu0 %v2136_v41  ;;  %889 = vmatmul.mubr.bf16.gmra.mrb[24].mxu1 %v2137_v42 }
  0x5a   :  { %1716 = vmatprep.mubr.msk.bf16.mxu0 %vm576_vm0, %v2138_v43  ;;  %1732 = vmatprep.mubr.msk.bf16.mxu1 %vm576_vm0, %v2140_v44 }
  0x61   :  { %769 = vmatmul.mubr.bf16.gmra.mrb[28].mxu0 %v2142_v45  ;;  %897 = vmatmul.mubr.bf16.gmra.mrb[28].mxu1 %v2143_v46 }
  0x62   :  { %1717 = vmatprep.mubr.msk.bf16.mxu0 %vm576_vm0, %v2144_v47  ;;  %1733 = vmatprep.mubr.msk.bf16.mxu1 %vm576_vm0, %v2146_v48 }
  0x69   :  { %777 = vmatmul.mubr.bf16.gmra.mrb[32].mxu0 %v2148_v49  ;;  %905 = vmatmul.mubr.bf16.gmra.mrb[32].mxu1 %v2149_v50 }
  0x6a   :  { %1718 = vmatprep.mubr.msk.bf16.mxu0 %vm576_vm0, %v2150_v51  ;;  %1734 = vmatprep.mubr.msk.bf16.mxu1 %vm576_vm0, %v2152_v52 }
  0x71   :  { %785 = vmatmul.mubr.bf16.gmra.mrb[36].mxu0 %v2154_v53  ;;  %913 = vmatmul.mubr.bf16.gmra.mrb[36].mxu1 %v2155_v54 }
  0x72   :  { %1719 = vmatprep.mubr.msk.bf16.mxu0 %vm576_vm0, %v2156_v55  ;;  %1735 = vmatprep.mubr.msk.bf16.mxu1 %vm576_vm0, %v2158_v56 }
  0x79   :  { %793 = vmatmul.mubr.bf16.gmra.mrb[40].mxu0 %v2160_v57  ;;  %921 = vmatmul.mubr.bf16.gmra.mrb[40].mxu1 %v2161_v58 }
  0x7a   :  { %1720 = vmatprep.mubr.msk.bf16.mxu0 %vm576_vm0, %v2162_v59  ;;  %1736 = vmatprep.mubr.msk.bf16.mxu1 %vm576_vm0, %v2164_v60 }
  0x81   :  { %801 = vmatmul.mubr.bf16.gmra.mrb[44].mxu0 %v2166_v61  ;;  %929 = vmatmul.mubr.bf16.gmra.mrb[44].mxu1 %v2167_v62 }
  0x82   :  { %1721 = vmatprep.mubr.msk.bf16.mxu0 %vm576_vm0, %v2168_v63  ;;  %1737 = vmatprep.mubr.msk.bf16.mxu1 %vm576_vm0, %v2170_v0 }
  0x89   :  { %809 = vmatmul.mubr.bf16.gmra.mrb[48].mxu0 %v2172_v1  ;;  %937 = vmatmul.mubr.bf16.gmra.mrb[48].mxu1 %v2173_v2 }
  0x8a   :  { %1722 = vmatprep.mubr.msk.bf16.mxu0 %vm576_vm0, %v2174_v3  ;;  %1738 = vmatprep.mubr.msk.bf16.mxu1 %vm576_vm0, %v2176_v4 }
  0x91   :  { %817 = vmatmul.mubr.bf16.gmra.mrb[52].mxu0 %v2178_v5  ;;  %945 = vmatmul.mubr.bf16.gmra.mrb[52].mxu1 %v2179_v6 }
  0x92   :  { %1723 = vmatprep.mubr.msk.bf16.mxu0 %vm576_vm0, %v2180_v7  ;;  %1739 = vmatprep.mubr.msk.bf16.mxu1 %vm576_vm0, %v2182_v8 }
  0x99   :  { %825 = vmatmul.mubr.bf16.gmra.mrb[56].mxu0 %v2184_v9  ;;  %953 = vmatmul.mubr.bf16.gmra.mrb[56].mxu1 %v2185_v10 }
  0x9a   :  { %1724 = vmatprep.mubr.msk.bf16.mxu0 %vm576_vm0, %v2186_v11  ;;  %1740 = vmatprep.mubr.msk.bf16.mxu1 %vm576_vm0, %v2188_v12 }
  0xa1   :  { %833 = vmatmul.mubr.bf16.gmra.mrb[60].mxu0 %v2190_v13  ;;  %961 = vmatmul.mubr.bf16.gmra.mrb[60].mxu1 %v2191_v14 }
  0xfc   :  { %v714_v16 = vpop.f32.mrb[0].mxu0  ;;  %v842_v17 = vpop.f32.mrb[0].mxu1 }
  0xfd   :  { %v1171_v18 = vadd.f32 %v2498_v15, %v714_v16  ;;  %v1203_v19 = vadd.f32 %v2498_v15, %v842_v17  ;;  %v716_v20 = vpop.f32.mrb[1].mxu0  ;;  %v844_v21 = vpop.f32.mrb[1].mxu1 }
  0xfe   :  { %v717_v22 = vpop.f32.mrb[2].mxu0  ;;  %v845_v23 = vpop.f32.mrb[2].mxu1 }
  0xff   :  { %v1172_v24 = vadd.f32 %v2498_v15, %v717_v22  ;;  %v1204_v25 = vadd.f32 %v2498_v15, %v845_v23  ;;  %v719_v26 = vpop.f32.mrb[3].mxu0  ;;  %v847_v27 = vpop.f32.mrb[3].mxu1  ;;  %v1235_v28 = vmax.f32 %v1171_v18, 0.0  ;;  %v1267_v29 = vmax.f32 %v1203_v19, 0.0 }
 0x101   :  { %v1236_v30 = vmax.f32 %v1172_v24, 0.0  ;;  %v1268_v31 = vmax.f32 %v1204_v25, 0.0 }
 0x103   :  { %v1873_v32 = vpack.c.bf16 %v1236_v30, %v1235_v28  ;;  %v1953_v33 = vpack.c.bf16 %v1268_v31, %v1267_v29 }
 0x104   :  { %v722_v34 = vpop.f32.mrb[4].mxu0  ;;  %v850_v35 = vpop.f32.mrb[4].mxu1 }
 0x105   :  { %1874 = vst [vmem:[#allocation3] sm:$0xff] %v1873_v32   ;;  %2045 = vst [vmem:[#allocation3 + $0x80] sm:$0xff] %v1953_v33   ;;  %v1173_v36 = vadd.f32 %v2498_v15, %v722_v34  ;;  %v1205_v37 = vadd.f32 %v2498_v15, %v850_v35  ;;  %v724_v38 = vpop.f32.mrb[5].mxu0  ;;  %v852_v39 = vpop.f32.mrb[5].mxu1 }
 0x106   :  { %v725_v40 = vpop.f32.mrb[6].mxu0  ;;  %v853_v41 = vpop.f32.mrb[6].mxu1 }
 0x107   :  { %v1174_v42 = vadd.f32 %v2498_v15, %v725_v40  ;;  %v1206_v43 = vadd.f32 %v2498_v15, %v853_v41  ;;  %v727_v44 = vpop.f32.mrb[7].mxu0  ;;  %v855_v45 = vpop.f32.mrb[7].mxu1  ;;  %v1237_v46 = vmax.f32 %v1173_v36, 0.0  ;;  %v1269_v47 = vmax.f32 %v1205_v37, 0.0 }
 0x109   :  { %v1238_v48 = vmax.f32 %v1174_v42, 0.0  ;;  %v1270_v49 = vmax.f32 %v1206_v43, 0.0 }
 0x10b   :  { %v1878_v50 = vpack.c.bf16 %v1238_v48, %v1237_v46  ;;  %v1958_v51 = vpack.c.bf16 %v1270_v49, %v1269_v47 }
 0x10c   :  { %v730_v52 = vpop.f32.mrb[8].mxu0  ;;  %v858_v53 = vpop.f32.mrb[8].mxu1 }
 0x10d   :  { %2030 = vst [vmem:[#allocation3 + $0x8] sm:$0xff] %v1878_v50   ;;  %2046 = vst [vmem:[#allocation3 + $0x88] sm:$0xff] %v1958_v51   ;;  %v1175_v54 = vadd.f32 %v2498_v15, %v730_v52  ;;  %v1207_v55 = vadd.f32 %v2498_v15, %v858_v53  ;;  %v732_v56 = vpop.f32.mrb[9].mxu0  ;;  %v860_v57 = vpop.f32.mrb[9].mxu1 }
 0x10e   :  { %v733_v58 = vpop.f32.mrb[10].mxu0  ;;  %v861_v59 = vpop.f32.mrb[10].mxu1 }
 0x10f   :  { %v1176_v60 = vadd.f32 %v2498_v15, %v733_v58  ;;  %v1208_v61 = vadd.f32 %v2498_v15, %v861_v59  ;;  %v735_v62 = vpop.f32.mrb[11].mxu0  ;;  %v863_v63 = vpop.f32.mrb[11].mxu1  ;;  %v1239_v0 = vmax.f32 %v1175_v54, 0.0  ;;  %v1271_v1 = vmax.f32 %v1207_v55, 0.0 }
 0x111   :  { %v1240_v2 = vmax.f32 %v1176_v60, 0.0  ;;  %v1272_v3 = vmax.f32 %v1208_v61, 0.0 }
 0x113   :  { %v1883_v4 = vpack.c.bf16 %v1240_v2, %v1239_v0  ;;  %v1963_v5 = vpack.c.bf16 %v1272_v3, %v1271_v1 }
 0x114   :  { %v738_v6 = vpop.f32.mrb[12].mxu0  ;;  %v866_v7 = vpop.f32.mrb[12].mxu1 }
 0x115   :  { %2031 = vst [vmem:[#allocation3 + $0x10] sm:$0xff] %v1883_v4   ;;  %2047 = vst [vmem:[#allocation3 + $0x90] sm:$0xff] %v1963_v5   ;;  %v1177_v8 = vadd.f32 %v2498_v15, %v738_v6  ;;  %v1209_v9 = vadd.f32 %v2498_v15, %v866_v7  ;;  %v740_v10 = vpop.f32.mrb[13].mxu0  ;;  %v868_v11 = vpop.f32.mrb[13].mxu1 }
 0x116   :  { %v741_v12 = vpop.f32.mrb[14].mxu0  ;;  %v869_v13 = vpop.f32.mrb[14].mxu1 }
 0x117   :  { %v1178_v14 = vadd.f32 %v2498_v15, %v741_v12  ;;  %v1210_v16 = vadd.f32 %v2498_v15, %v869_v13  ;;  %v743_v17 = vpop.f32.mrb[15].mxu0  ;;  %v871_v18 = vpop.f32.mrb[15].mxu1  ;;  %v1241_v19 = vmax.f32 %v1177_v8, 0.0  ;;  %v1273_v20 = vmax.f32 %v1209_v9, 0.0 }
 0x119   :  { %v1242_v21 = vmax.f32 %v1178_v14, 0.0  ;;  %v1274_v22 = vmax.f32 %v1210_v16, 0.0 }
 0x11b   :  { %v1888_v23 = vpack.c.bf16 %v1242_v21, %v1241_v19  ;;  %v1968_v24 = vpack.c.bf16 %v1274_v22, %v1273_v20 }
 0x11c   :  { %v746_v25 = vpop.f32.mrb[16].mxu0  ;;  %v874_v26 = vpop.f32.mrb[16].mxu1 }
 0x11d   :  { %2032 = vst [vmem:[#allocation3 + $0x18] sm:$0xff] %v1888_v23   ;;  %2048 = vst [vmem:[#allocation3 + $0x98] sm:$0xff] %v1968_v24   ;;  %v1179_v27 = vadd.f32 %v2498_v15, %v746_v25  ;;  %v1211_v28 = vadd.f32 %v2498_v15, %v874_v26  ;;  %v748_v29 = vpop.f32.mrb[17].mxu0  ;;  %v876_v30 = vpop.f32.mrb[17].mxu1 }
 0x11e   :  { %v749_v31 = vpop.f32.mrb[18].mxu0  ;;  %v877_v32 = vpop.f32.mrb[18].mxu1 }
 0x11f   :  { %v1180_v33 = vadd.f32 %v2498_v15, %v749_v31  ;;  %v1212_v34 = vadd.f32 %v2498_v15, %v877_v32  ;;  %v751_v35 = vpop.f32.mrb[19].mxu0  ;;  %v879_v36 = vpop.f32.mrb[19].mxu1  ;;  %v1243_v37 = vmax.f32 %v1179_v27, 0.0  ;;  %v1275_v38 = vmax.f32 %v1211_v28, 0.0 }
 0x121   :  { %v1244_v39 = vmax.f32 %v1180_v33, 0.0  ;;  %v1276_v40 = vmax.f32 %v1212_v34, 0.0 }
 0x123   :  { %v1893_v41 = vpack.c.bf16 %v1244_v39, %v1243_v37  ;;  %v1973_v42 = vpack.c.bf16 %v1276_v40, %v1275_v38 }
 0x124   :  { %v754_v43 = vpop.f32.mrb[20].mxu0  ;;  %v882_v44 = vpop.f32.mrb[20].mxu1 }
 0x125   :  { %2033 = vst [vmem:[#allocation3 + $0x20] sm:$0xff] %v1893_v41   ;;  %2049 = vst [vmem:[#allocation3 + $0xa0] sm:$0xff] %v1973_v42   ;;  %v1181_v45 = vadd.f32 %v2498_v15, %v754_v43  ;;  %v1213_v46 = vadd.f32 %v2498_v15, %v882_v44  ;;  %v756_v47 = vpop.f32.mrb[21].mxu0  ;;  %v884_v48 = vpop.f32.mrb[21].mxu1 }
 0x126   :  { %v757_v49 = vpop.f32.mrb[22].mxu0  ;;  %v885_v50 = vpop.f32.mrb[22].mxu1 }
 0x127   :  { %v1182_v51 = vadd.f32 %v2498_v15, %v757_v49  ;;  %v1214_v52 = vadd.f32 %v2498_v15, %v885_v50  ;;  %v759_v53 = vpop.f32.mrb[23].mxu0  ;;  %v887_v54 = vpop.f32.mrb[23].mxu1  ;;  %v1245_v55 = vmax.f32 %v1181_v45, 0.0  ;;  %v1277_v56 = vmax.f32 %v1213_v46, 0.0 }
 0x129   :  { %v1246_v57 = vmax.f32 %v1182_v51, 0.0  ;;  %v1278_v58 = vmax.f32 %v1214_v52, 0.0 }
 0x12b   :  { %v1898_v59 = vpack.c.bf16 %v1246_v57, %v1245_v55  ;;  %v1978_v60 = vpack.c.bf16 %v1278_v58, %v1277_v56 }
 0x12c   :  { %v762_v61 = vpop.f32.mrb[24].mxu0  ;;  %v890_v62 = vpop.f32.mrb[24].mxu1 }
 0x12d   :  { %2034 = vst [vmem:[#allocation3 + $0x28] sm:$0xff] %v1898_v59   ;;  %2050 = vst [vmem:[#allocation3 + $0xa8] sm:$0xff] %v1978_v60   ;;  %v1183_v63 = vadd.f32 %v2498_v15, %v762_v61  ;;  %v1215_v0 = vadd.f32 %v2498_v15, %v890_v62  ;;  %v764_v1 = vpop.f32.mrb[25].mxu0  ;;  %v892_v2 = vpop.f32.mrb[25].mxu1 }
 0x12e   :  { %v765_v3 = vpop.f32.mrb[26].mxu0  ;;  %v893_v4 = vpop.f32.mrb[26].mxu1 }
 0x12f   :  { %v1184_v5 = vadd.f32 %v2498_v15, %v765_v3  ;;  %v1216_v6 = vadd.f32 %v2498_v15, %v893_v4  ;;  %v767_v7 = vpop.f32.mrb[27].mxu0  ;;  %v895_v8 = vpop.f32.mrb[27].mxu1  ;;  %v1247_v9 = vmax.f32 %v1183_v63, 0.0  ;;  %v1279_v10 = vmax.f32 %v1215_v0, 0.0 }
 0x131   :  { %v1248_v11 = vmax.f32 %v1184_v5, 0.0  ;;  %v1280_v12 = vmax.f32 %v1216_v6, 0.0 }
 0x133   :  { %v1903_v13 = vpack.c.bf16 %v1248_v11, %v1247_v9  ;;  %v1983_v14 = vpack.c.bf16 %v1280_v12, %v1279_v10 }
 0x134   :  { %v770_v16 = vpop.f32.mrb[28].mxu0  ;;  %v898_v17 = vpop.f32.mrb[28].mxu1 }
 0x135   :  { %2035 = vst [vmem:[#allocation3 + $0x30] sm:$0xff] %v1903_v13   ;;  %2051 = vst [vmem:[#allocation3 + $0xb0] sm:$0xff] %v1983_v14   ;;  %v1185_v18 = vadd.f32 %v2498_v15, %v770_v16  ;;  %v1217_v19 = vadd.f32 %v2498_v15, %v898_v17  ;;  %v772_v20 = vpop.f32.mrb[29].mxu0  ;;  %v900_v21 = vpop.f32.mrb[29].mxu1 }
 0x136   :  { %v773_v22 = vpop.f32.mrb[30].mxu0  ;;  %v901_v23 = vpop.f32.mrb[30].mxu1 }
 0x137   :  { %v1186_v24 = vadd.f32 %v2498_v15, %v773_v22  ;;  %v1218_v25 = vadd.f32 %v2498_v15, %v901_v23  ;;  %v775_v26 = vpop.f32.mrb[31].mxu0  ;;  %v903_v27 = vpop.f32.mrb[31].mxu1  ;;  %v1249_v28 = vmax.f32 %v1185_v18, 0.0  ;;  %v1281_v29 = vmax.f32 %v1217_v19, 0.0 }
 0x139   :  { %v1250_v30 = vmax.f32 %v1186_v24, 0.0  ;;  %v1282_v31 = vmax.f32 %v1218_v25, 0.0 }
 0x13b   :  { %v1908_v32 = vpack.c.bf16 %v1250_v30, %v1249_v28  ;;  %v1988_v33 = vpack.c.bf16 %v1282_v31, %v1281_v29 }
 0x13c   :  { %v778_v34 = vpop.f32.mrb[32].mxu0  ;;  %v906_v35 = vpop.f32.mrb[32].mxu1 }
 0x13d   :  { %2036 = vst [vmem:[#allocation3 + $0x38] sm:$0xff] %v1908_v32   ;;  %2052 = vst [vmem:[#allocation3 + $0xb8] sm:$0xff] %v1988_v33   ;;  %v1187_v36 = vadd.f32 %v2498_v15, %v778_v34  ;;  %v1219_v37 = vadd.f32 %v2498_v15, %v906_v35  ;;  %v780_v38 = vpop.f32.mrb[33].mxu0  ;;  %v908_v39 = vpop.f32.mrb[33].mxu1 }
 0x13e   :  { %v781_v40 = vpop.f32.mrb[34].mxu0  ;;  %v909_v41 = vpop.f32.mrb[34].mxu1 }
 0x13f   :  { %v1188_v42 = vadd.f32 %v2498_v15, %v781_v40  ;;  %v1220_v43 = vadd.f32 %v2498_v15, %v909_v41  ;;  %v783_v44 = vpop.f32.mrb[35].mxu0  ;;  %v911_v45 = vpop.f32.mrb[35].mxu1  ;;  %v1251_v46 = vmax.f32 %v1187_v36, 0.0  ;;  %v1283_v47 = vmax.f32 %v1219_v37, 0.0 }
 0x141   :  { %v1252_v48 = vmax.f32 %v1188_v42, 0.0  ;;  %v1284_v49 = vmax.f32 %v1220_v43, 0.0 }
 0x143   :  { %v1913_v50 = vpack.c.bf16 %v1252_v48, %v1251_v46  ;;  %v1993_v51 = vpack.c.bf16 %v1284_v49, %v1283_v47 }
 0x144   :  { %v786_v52 = vpop.f32.mrb[36].mxu0  ;;  %v914_v53 = vpop.f32.mrb[36].mxu1 }
 0x145   :  { %2037 = vst [vmem:[#allocation3 + $0x40] sm:$0xff] %v1913_v50   ;;  %2053 = vst [vmem:[#allocation3 + $0xc0] sm:$0xff] %v1993_v51   ;;  %v1189_v54 = vadd.f32 %v2498_v15, %v786_v52  ;;  %v1221_v55 = vadd.f32 %v2498_v15, %v914_v53  ;;  %v788_v56 = vpop.f32.mrb[37].mxu0  ;;  %v916_v57 = vpop.f32.mrb[37].mxu1 }
 0x146   :  { %v789_v58 = vpop.f32.mrb[38].mxu0  ;;  %v917_v59 = vpop.f32.mrb[38].mxu1 }
 0x147   :  { %v1190_v60 = vadd.f32 %v2498_v15, %v789_v58  ;;  %v1222_v61 = vadd.f32 %v2498_v15, %v917_v59  ;;  %v791_v62 = vpop.f32.mrb[39].mxu0  ;;  %v919_v63 = vpop.f32.mrb[39].mxu1  ;;  %v1253_v0 = vmax.f32 %v1189_v54, 0.0  ;;  %v1285_v1 = vmax.f32 %v1221_v55, 0.0 }
 0x149   :  { %v1254_v2 = vmax.f32 %v1190_v60, 0.0  ;;  %v1286_v3 = vmax.f32 %v1222_v61, 0.0 }
 0x14b   :  { %v1918_v4 = vpack.c.bf16 %v1254_v2, %v1253_v0  ;;  %v1998_v5 = vpack.c.bf16 %v1286_v3, %v1285_v1 }
 0x14c   :  { %v794_v6 = vpop.f32.mrb[40].mxu0  ;;  %v922_v7 = vpop.f32.mrb[40].mxu1 }
 0x14d   :  { %2038 = vst [vmem:[#allocation3 + $0x48] sm:$0xff] %v1918_v4   ;;  %2054 = vst [vmem:[#allocation3 + $0xc8] sm:$0xff] %v1998_v5   ;;  %v1191_v8 = vadd.f32 %v2498_v15, %v794_v6  ;;  %v1223_v9 = vadd.f32 %v2498_v15, %v922_v7  ;;  %v796_v10 = vpop.f32.mrb[41].mxu0  ;;  %v924_v11 = vpop.f32.mrb[41].mxu1 }
 0x14e   :  { %v797_v12 = vpop.f32.mrb[42].mxu0  ;;  %v925_v13 = vpop.f32.mrb[42].mxu1 }
 0x14f   :  { %v1192_v14 = vadd.f32 %v2498_v15, %v797_v12  ;;  %v1224_v16 = vadd.f32 %v2498_v15, %v925_v13  ;;  %v799_v17 = vpop.f32.mrb[43].mxu0  ;;  %v927_v18 = vpop.f32.mrb[43].mxu1  ;;  %v1255_v19 = vmax.f32 %v1191_v8, 0.0  ;;  %v1287_v20 = vmax.f32 %v1223_v9, 0.0 }
 0x151   :  { %v1256_v21 = vmax.f32 %v1192_v14, 0.0  ;;  %v1288_v22 = vmax.f32 %v1224_v16, 0.0 }
 0x153   :  { %v1923_v23 = vpack.c.bf16 %v1256_v21, %v1255_v19  ;;  %v2003_v24 = vpack.c.bf16 %v1288_v22, %v1287_v20 }
 0x154   :  { %v802_v25 = vpop.f32.mrb[44].mxu0  ;;  %v930_v26 = vpop.f32.mrb[44].mxu1 }
 0x155   :  { %2039 = vst [vmem:[#allocation3 + $0x50] sm:$0xff] %v1923_v23   ;;  %2055 = vst [vmem:[#allocation3 + $0xd0] sm:$0xff] %v2003_v24   ;;  %v1193_v27 = vadd.f32 %v2498_v15, %v802_v25  ;;  %v1225_v28 = vadd.f32 %v2498_v15, %v930_v26  ;;  %v804_v29 = vpop.f32.mrb[45].mxu0  ;;  %v932_v30 = vpop.f32.mrb[45].mxu1 }
 0x156   :  { %v805_v31 = vpop.f32.mrb[46].mxu0  ;;  %v933_v32 = vpop.f32.mrb[46].mxu1 }
 0x157   :  { %v1194_v33 = vadd.f32 %v2498_v15, %v805_v31  ;;  %v1226_v34 = vadd.f32 %v2498_v15, %v933_v32  ;;  %v807_v35 = vpop.f32.mrb[47].mxu0  ;;  %v935_v36 = vpop.f32.mrb[47].mxu1  ;;  %v1257_v37 = vmax.f32 %v1193_v27, 0.0  ;;  %v1289_v38 = vmax.f32 %v1225_v28, 0.0 }
 0x159   :  { %v1258_v39 = vmax.f32 %v1194_v33, 0.0  ;;  %v1290_v40 = vmax.f32 %v1226_v34, 0.0 }
 0x15b   :  { %v1928_v41 = vpack.c.bf16 %v1258_v39, %v1257_v37  ;;  %v2008_v42 = vpack.c.bf16 %v1290_v40, %v1289_v38 }
 0x15c   :  { %v810_v43 = vpop.f32.mrb[48].mxu0  ;;  %v938_v44 = vpop.f32.mrb[48].mxu1 }
 0x15d   :  { %2040 = vst [vmem:[#allocation3 + $0x58] sm:$0xff] %v1928_v41   ;;  %2056 = vst [vmem:[#allocation3 + $0xd8] sm:$0xff] %v2008_v42   ;;  %v1195_v45 = vadd.f32 %v2498_v15, %v810_v43  ;;  %v1227_v46 = vadd.f32 %v2498_v15, %v938_v44  ;;  %v812_v47 = vpop.f32.mrb[49].mxu0  ;;  %v940_v48 = vpop.f32.mrb[49].mxu1 }
 0x15e   :  { %v813_v49 = vpop.f32.mrb[50].mxu0  ;;  %v941_v50 = vpop.f32.mrb[50].mxu1 }
 0x15f   :  { %v1196_v51 = vadd.f32 %v2498_v15, %v813_v49  ;;  %v1228_v52 = vadd.f32 %v2498_v15, %v941_v50  ;;  %v815_v53 = vpop.f32.mrb[51].mxu0  ;;  %v943_v54 = vpop.f32.mrb[51].mxu1  ;;  %v1259_v55 = vmax.f32 %v1195_v45, 0.0  ;;  %v1291_v56 = vmax.f32 %v1227_v46, 0.0 }
 0x161   :  { %v1260_v57 = vmax.f32 %v1196_v51, 0.0  ;;  %v1292_v58 = vmax.f32 %v1228_v52, 0.0 }
 0x163   :  { %v1933_v59 = vpack.c.bf16 %v1260_v57, %v1259_v55  ;;  %v2013_v60 = vpack.c.bf16 %v1292_v58, %v1291_v56 }
 0x164   :  { %v818_v61 = vpop.f32.mrb[52].mxu0  ;;  %v946_v62 = vpop.f32.mrb[52].mxu1 }
 0x165   :  { %2041 = vst [vmem:[#allocation3 + $0x60] sm:$0xff] %v1933_v59   ;;  %2057 = vst [vmem:[#allocation3 + $0xe0] sm:$0xff] %v2013_v60   ;;  %v1197_v63 = vadd.f32 %v2498_v15, %v818_v61  ;;  %v1229_v0 = vadd.f32 %v2498_v15, %v946_v62  ;;  %v820_v1 = vpop.f32.mrb[53].mxu0  ;;  %v948_v2 = vpop.f32.mrb[53].mxu1 }
 0x166   :  { %v821_v3 = vpop.f32.mrb[54].mxu0  ;;  %v949_v4 = vpop.f32.mrb[54].mxu1 }
 0x167   :  { %v1198_v5 = vadd.f32 %v2498_v15, %v821_v3  ;;  %v1230_v6 = vadd.f32 %v2498_v15, %v949_v4  ;;  %v823_v7 = vpop.f32.mrb[55].mxu0  ;;  %v951_v8 = vpop.f32.mrb[55].mxu1  ;;  %v1261_v9 = vmax.f32 %v1197_v63, 0.0  ;;  %v1293_v10 = vmax.f32 %v1229_v0, 0.0 }
 0x169   :  { %v1262_v11 = vmax.f32 %v1198_v5, 0.0  ;;  %v1294_v12 = vmax.f32 %v1230_v6, 0.0 }
 0x16b   :  { %v1938_v13 = vpack.c.bf16 %v1262_v11, %v1261_v9  ;;  %v2018_v14 = vpack.c.bf16 %v1294_v12, %v1293_v10 }
 0x16c   :  { %v826_v16 = vpop.f32.mrb[56].mxu0  ;;  %v954_v17 = vpop.f32.mrb[56].mxu1 }
 0x16d   :  { %2042 = vst [vmem:[#allocation3 + $0x68] sm:$0xff] %v1938_v13   ;;  %2058 = vst [vmem:[#allocation3 + $0xe8] sm:$0xff] %v2018_v14   ;;  %v1199_v18 = vadd.f32 %v2498_v15, %v826_v16  ;;  %v1231_v19 = vadd.f32 %v2498_v15, %v954_v17  ;;  %v828_v20 = vpop.f32.mrb[57].mxu0  ;;  %v956_v21 = vpop.f32.mrb[57].mxu1 }
 0x16e   :  { %v829_v22 = vpop.f32.mrb[58].mxu0  ;;  %v957_v23 = vpop.f32.mrb[58].mxu1 }
 0x16f   :  { %v1200_v24 = vadd.f32 %v2498_v15, %v829_v22  ;;  %v1232_v25 = vadd.f32 %v2498_v15, %v957_v23  ;;  %v831_v26 = vpop.f32.mrb[59].mxu0  ;;  %v959_v27 = vpop.f32.mrb[59].mxu1  ;;  %v1263_v28 = vmax.f32 %v1199_v18, 0.0  ;;  %v1295_v29 = vmax.f32 %v1231_v19, 0.0 }
 0x171   :  { %v1264_v30 = vmax.f32 %v1200_v24, 0.0  ;;  %v1296_v31 = vmax.f32 %v1232_v25, 0.0 }
 0x173   :  { %v1943_v32 = vpack.c.bf16 %v1264_v30, %v1263_v28  ;;  %v2023_v33 = vpack.c.bf16 %v1296_v31, %v1295_v29 }
 0x174   :  { %v834_v34 = vpop.f32.mrb[60].mxu0  ;;  %v962_v35 = vpop.f32.mrb[60].mxu1 }
 0x175   :  { %2043 = vst [vmem:[#allocation3 + $0x70] sm:$0xff] %v1943_v32   ;;  %2059 = vst [vmem:[#allocation3 + $0xf0] sm:$0xff] %v2023_v33   ;;  %v1201_v36 = vadd.f32 %v2498_v15, %v834_v34  ;;  %v1233_v37 = vadd.f32 %v2498_v15, %v962_v35  ;;  %v836_v38 = vpop.f32.mrb[61].mxu0  ;;  %v964_v39 = vpop.f32.mrb[61].mxu1 }
 0x176   :  { %v837_v40 = vpop.f32.mrb[62].mxu0  ;;  %v965_v41 = vpop.f32.mrb[62].mxu1 }
 0x177   :  { %v1202_v42 = vadd.f32 %v2498_v15, %v837_v40  ;;  %v1234_v43 = vadd.f32 %v2498_v15, %v965_v41  ;;  %v839_v44 = vpop.f32.mrb[63].mxu0  ;;  %v967_v45 = vpop.f32.mrb[63].mxu1  ;;  %v1265_v46 = vmax.f32 %v1201_v36, 0.0  ;;  %v1297_v47 = vmax.f32 %v1233_v37, 0.0 }
 0x179   :  { %v1266_v48 = vmax.f32 %v1202_v42, 0.0  ;;  %v1298_v49 = vmax.f32 %v1234_v43, 0.0 }
 0x17b   :  { %v1948_v50 = vpack.c.bf16 %v1266_v48, %v1265_v46  ;;  %v2028_v51 = vpack.c.bf16 %v1298_v49, %v1297_v47 }
 0x17d   :  { %2044 = vst [vmem:[#allocation3 + $0x78] sm:$0xff] %v1948_v50   ;;  %2060 = vst [vmem:[#allocation3 + $0xf8] sm:$0xff] %v2028_v51  }
 0x17e   :  { %2203 = shalt.err (!%p2200_p4)
}
 0x17f   :  { %s2204_s25 = scalar_lea.hbm %s2579_s3, 4096 }
 0x180   :  { %p2205_p5 = scmp.ne.s32.totalorder %s2579_s3, %s2204_s25  ;;  %p2208_p6 = scmp.lt.u32.totalorder %s2204_s25, %s2579_s3 }
 0x182   :  { %p2210_p7 = pnand %p2208_p6, %p2205_p5 }
 0x184   :  { %2213 = shalt.err (!%p2210_p7)
}
 0x185   :  { %s2219_s30 = smov 64   ;;  %s2220_s4 = smov 4  }
 0x186   :  { %1630 = dma.vmem_to_hbm [thread:$0]  %s1625_s2, 4096, %s2579_s3, [#allocation4], %s2219_s30, %s2219_s30, %s2220_s4  }
 0x187   :  { %2214 = dma.done.wait [#allocation4], 4096  }
 0x188   :  { %2215 = vsyncadd [#allocation4], 4294963200 }
 0x189   :  { %1634 = vsyncpa [#allocation4], 1 }

</bundles_post_ra>
